<compile_context>
chip_gen: v7x
topology: tpu7x:2x2x1
jax: 0.10.0
libtpu: 0.0.40
codegen_flags: <defaults>
</compile_context>

<pallas_src>
import functools

import jax
import jax.numpy as jnp
from jax.experimental import pallas as pl
from jax.experimental.pallas import tpu as pltpu


def _round_up(x, m):
    return (x + m - 1) // m * m


def _vmem_capacity_bytes():
    """Physical per-core VMEM (v5e/v6e: 128 MiB, v7x: 64 MiB)."""
    try:
        cap = getattr(pltpu.get_tpu_info(), "vmem_capacity_bytes", None)
        if cap:
            return int(cap)
    except Exception:
        pass
    return 64 << 20  # conservative fallback (v7x per-TensorCore VMEM)


# ----------------------------------------------------------------------------
# Fused kernel: sequential LSTM recurrence + output-projection epilogue.
# Row layout inside the kernel is 2-D: row = t * B_pad + b (lane-dense blocks).
# ----------------------------------------------------------------------------
def lstm_fused_kernel(gx_ref, whh_ref, wln_ref, bln_ref, out_ref,
                      h_scr, c_scr, hblk_scr):
    tb = pl.program_id(0)

    @pl.when(tb == 0)
    def _init():
        h_scr[...] = jnp.zeros_like(h_scr)
        c_scr[...] = jnp.zeros_like(c_scr)

    B, H = h_scr.shape                 # padded batch (x16), padded hidden (x128)
    t_blk = gx_ref.shape[0] // B       # timesteps handled in this grid step

    def sig(x):                        # sigmoid via tanh: fewer EUP ops/step
        return 0.5 * (jnp.tanh(0.5 * x) + 1.0)

    def step(t, carry):
        del carry
        row0 = pl.multiple_of(t * B, B)
        gx = gx_ref[pl.ds(row0, B), :].astype(jnp.float32)     # (B, 4H) x-proj + biases
        h_prev = h_scr[...]                                    # (B, H) bf16
        c_prev = c_scr[...]                                    # (B, H) f32

        # Recurrent projection; W_hh indexed inside the loop (not hoisted) so
        # the register allocator is free to re-load instead of pinning vregs.
        gates = gx + jnp.dot(h_prev, whh_ref[...],
                             preferred_element_type=jnp.float32)

        # PyTorch gate order [i, f, g, o]; slices are lane-tile aligned.
        i_g = sig(gates[:, 0 * H:1 * H])
        f_g = sig(gates[:, 1 * H:2 * H])
        g_g = jnp.tanh(gates[:, 2 * H:3 * H])
        o_g = sig(gates[:, 3 * H:4 * H])

        c_new = f_g * c_prev + i_g * g_g
        h_new = (o_g * jnp.tanh(c_new)).astype(jnp.bfloat16)

        h_scr[...] = h_new
        c_scr[...] = c_new
        hblk_scr[pl.ds(row0, B), :] = h_new
        return 0

    # Partial unroll: LLO scheduler visibility without vreg spills at t_blk=32.
    jax.lax.fori_loop(0, t_blk, step, 0, unroll=4)

    # Fused output projection: one lane-dense matmul over the whole block,
    # off the serial h->h chain (rides MXU slack while the next gx block DMA
    # is in flight).  h never round-trips through HBM.
    out_ref[...] = (jnp.dot(hblk_scr[...], wln_ref[...],
                            preferred_element_type=jnp.float32)
                    + bln_ref[...])


# ----------------------------------------------------------------------------
# Forward wrapper (glue: embedding gather, hoisted x-projection, padding).
# ----------------------------------------------------------------------------
def my_lstm_forward(tokens, params, *, t_blk=32):
    """tokens: (seq, batch) int32 -> (seq, batch, posn) float32."""
    emb_table = params["embd"]          # (vocsize, hdim)
    w_ih = params["w_ih"]               # (hdim, 4*hdim)  (pre-transposed)
    w_hh = params["w_hh"]               # (hdim, 4*hdim)  (pre-transposed)
    b = params["b"]                     # (1, 4*hdim)     (b_ih + b_hh)
    w_ln = params["w_ln"]               # (hdim, posn)    (pre-transposed)
    b_ln = params["b_ln"]               # (1, posn)

    seq, batch = tokens.shape
    hdim = emb_table.shape[1]
    posn = w_ln.shape[1]

    H_pad = _round_up(hdim, 128)        # lane-aligned hidden
    B_pad = _round_up(batch, 16)        # bf16 sublane packing is (16, 128)
    P_pad = _round_up(posn, 128)        # lane-dense output
    t_blk = max(1, min(t_blk, seq))
    seq_pad = _round_up(seq, t_blk)

    # --- Pad weights per-gate ONCE (so i/f/g/o blocks stay lane-contiguous) --
    w_ih_pad = jnp.pad(w_ih.reshape(hdim, 4, hdim),
                       ((0, 0), (0, 0), (0, H_pad - hdim))
                       ).reshape(hdim, 4 * H_pad)
    b_pad = jnp.pad(b.reshape(1, 4, hdim),
                    ((0, 0), (0, 0), (0, H_pad - hdim))).reshape(1, 4 * H_pad)
    w_hh_pad = jnp.pad(w_hh.reshape(hdim, 4, hdim),
                       ((0, H_pad - hdim), (0, 0), (0, H_pad - hdim))
                       ).reshape(H_pad, 4 * H_pad).astype(jnp.bfloat16)
    w_ln_pad = jnp.pad(w_ln, ((0, H_pad - hdim), (0, P_pad - posn))
                       ).astype(jnp.bfloat16)
    b_ln_pad = jnp.pad(b_ln, ((0, 0), (0, P_pad - posn))).astype(jnp.float32)

    # --- Hoisted, time-independent input projection (one big MXU matmul), ---
    # cast to bf16 at the einsum output (no padded f32 intermediate in HBM).
    x_emb = jnp.take(emb_table, tokens, axis=0)                 # (seq, batch, hdim)
    gx = (jnp.einsum("sbh,hg->sbg", x_emb, w_ih_pad,
                     preferred_element_type=jnp.float32)
          + b_pad).astype(jnp.bfloat16)                         # (seq, batch, 4*H_pad)
    gx = jnp.pad(gx, ((0, seq_pad - seq), (0, B_pad - batch), (0, 0)))
    gx2d = gx.reshape(seq_pad * B_pad, 4 * H_pad)               # row = s*B_pad + b

    # --- VMEM budget: never above the physical per-core capacity (v7x=64MiB) -
    whh_bytes = H_pad * 4 * H_pad * 2
    wln_bytes = H_pad * P_pad * 2
    gx_blk_bytes = t_blk * B_pad * 4 * H_pad * 2
    out_blk_bytes = t_blk * B_pad * P_pad * 4
    scratch_bytes = B_pad * H_pad * (2 + 4) + t_blk * B_pad * H_pad * 2
    needed = (2 * (whh_bytes + wln_bytes)           # weight pipeline buffers
              + 2 * (gx_blk_bytes + out_blk_bytes)  # streamed double buffers
              + scratch_bytes + (8 << 20))          # compiler headroom
    vmem_limit = max(min(needed, _vmem_capacity_bytes() - (2 << 20)), 16 << 20)

    out2d = pl.pallas_call(
        lstm_fused_kernel,
        out_shape=jax.ShapeDtypeStruct((seq_pad * B_pad, P_pad), jnp.float32),
        grid_spec=pltpu.PrefetchScalarGridSpec(
            num_scalar_prefetch=0,
            grid=(seq_pad // t_blk,),
            in_specs=[
                # Streamed gx blocks: t_blk timesteps x padded batch rows.
                pl.BlockSpec((t_blk * B_pad, 4 * H_pad), lambda tb: (tb, 0)),
                # Weights: constant block index -> fetched once by the
                # pipeline, overlapping the first gx DMA (no in-kernel stall).
                # TODO(synk): pipeline_mode=pl.Buffered(1) to drop the unused
                # second weight buffer once hdim is large enough to matter.
                pl.BlockSpec((H_pad, 4 * H_pad), lambda tb: (0, 0)),
                pl.BlockSpec((H_pad, P_pad), lambda tb: (0, 0)),
                pl.BlockSpec((1, P_pad), lambda tb: (0, 0)),
            ],
            out_specs=pl.BlockSpec((t_blk * B_pad, P_pad), lambda tb: (tb, 0)),
            scratch_shapes=[
                pltpu.VMEM((B_pad, H_pad), jnp.bfloat16),          # h state
                pltpu.VMEM((B_pad, H_pad), jnp.float32),           # c state
                pltpu.VMEM((t_blk * B_pad, H_pad), jnp.bfloat16),  # h block
            ],
        ),
        compiler_params=pltpu.CompilerParams(
            dimension_semantics=("arbitrary",),     # sequential: h/c carried
            vmem_limit_bytes=vmem_limit),
    )(gx2d, w_hh_pad, w_ln_pad, b_ln_pad)

    out = out2d.reshape(seq_pad, B_pad, P_pad)[:seq, :batch, :posn]
    return out


# ----------------------------------------------------------------------------
# Plain-JAX f32 reference (mirrors PyTorch nn.LSTM semantics) for validation.
# ----------------------------------------------------------------------------
def lstm_reference(tokens, params):
    x = jnp.take(params["embd"], tokens, axis=0)          # (seq, batch, hdim)
    seq, batch, hdim = x.shape
    w_ih, w_hh = params["w_ih"], params["w_hh"]
    b = params["b"][0]
    h = jnp.zeros((batch, hdim), jnp.float32)
    c = jnp.zeros((batch, hdim), jnp.float32)
    hs = []
    for t in range(seq):
        gates = x[t] @ w_ih + h @ w_hh + b
        i_g = jax.nn.sigmoid(gates[:, 0 * hdim:1 * hdim])
        f_g = jax.nn.sigmoid(gates[:, 1 * hdim:2 * hdim])
        g_g = jnp.tanh(gates[:, 2 * hdim:3 * hdim])
        o_g = jax.nn.sigmoid(gates[:, 3 * hdim:4 * hdim])
        c = f_g * c + i_g * g_g
        h = o_g * jnp.tanh(c)
        hs.append(h)
    lo = jnp.stack(hs)                                     # (seq, batch, hdim)
    return lo @ params["w_ln"] + params["b_ln"][0]


def init_params(key, vocsize, posn, hdim):
    ks = jax.random.split(key, 7)
    scale = 0.1
    embd = jax.random.normal(ks[0], (vocsize, hdim), jnp.float32) * scale
    # PyTorch stores weight_ih_l0 as (4*hdim, hdim); we pre-transpose for x @ W.
    w_ih = jax.random.normal(ks[1], (hdim, 4 * hdim), jnp.float32) * scale
    w_hh = jax.random.normal(ks[2], (hdim, 4 * hdim), jnp.float32) * scale
    b_ih = jax.random.normal(ks[3], (4 * hdim,), jnp.float32) * scale
    b_hh = jax.random.normal(ks[4], (4 * hdim,), jnp.float32) * scale
    w_ln = jax.random.normal(ks[5], (hdim, posn), jnp.float32) * scale
    b_ln = jax.random.normal(ks[6], (posn,), jnp.float32) * scale
    return {
        "embd": embd,
        "w_ih": w_ih,
        "w_hh": w_hh,
        "b": (b_ih + b_hh).reshape(1, 4 * hdim),
        "w_ln": w_ln,
        "b_ln": b_ln.reshape(1, posn),
    }


if __name__ == "__main__":
    vocsize, posn, hdim = 16, 8, 32
    seq, batch = 8, 2

    key = jax.random.PRNGKey(0)
    pkey, xkey = jax.random.split(key)
    params = init_params(pkey, vocsize, posn, hdim)
    tokens = jax.random.randint(xkey, (seq, batch), 0, vocsize, jnp.int32)

    # t_blk=4 -> 2 sequential grid steps, exercising the h/c carry across steps.
    fwd = jax.jit(functools.partial(my_lstm_forward, t_blk=4))
    out = jax.block_until_ready(fwd(tokens, params))
    assert out.shape == (seq, batch, posn), out.shape

    ref = lstm_reference(tokens, params)
    err = float(jnp.max(jnp.abs(out - ref)))
    assert err < 2e-2, f"max abs err vs f32 reference: {err}"
    print("KERNEL_OK")
</pallas_src>

<mosaic_0001>
module attributes {stable_mosaic.version = 11 : i64} {
  func.func @lstm_fused_kernel(%arg0: i32, %arg1: memref<64x512xbf16, #tpu.memory_space<vmem>>, %arg2: memref<128x512xbf16, #tpu.memory_space<vmem>>, %arg3: memref<128x128xbf16, #tpu.memory_space<vmem>>, %arg4: memref<1x128xf32, #tpu.memory_space<vmem>>, %arg5: memref<64x128xf32, #tpu.memory_space<vmem>>, %arg6: memref<16x128xbf16, #tpu.memory_space<vmem>>, %arg7: memref<16x128xf32, #tpu.memory_space<vmem>>, %arg8: memref<64x128xbf16, #tpu.memory_space<vmem>>) attributes {dimension_semantics = [#tpu.dimension_semantics<arbitrary>], iteration_bounds = array<i64: 2>, scalar_prefetch = 0 : i64, scratch_operands = 3 : i64, tpu.core_type = #tpu.core_type<tc>, window_params = [{transform_indices = @transform_0, window_bounds = array<i64: 64, 512>}, {pipeline_mode = #tpu.pipeline_mode<synchronous>, transform_indices = @transform_1, window_bounds = array<i64: 128, 512>}, {pipeline_mode = #tpu.pipeline_mode<synchronous>, transform_indices = @transform_2, window_bounds = array<i64: 128, 128>}, {pipeline_mode = #tpu.pipeline_mode<synchronous>, transform_indices = @transform_3, window_bounds = array<i64: 1, 128>}, {transform_indices = @transform_4, window_bounds = array<i64: 64, 128>}]} {
    %c0_i32 = arith.constant 0 : i32
    %0 = arith.cmpi eq, %arg0, %c0_i32 : i32
    %1 = arith.extui %0 : i1 to i32
    %c0_i32_0 = arith.constant 0 : i32
    %2 = arith.cmpi ne, %1, %c0_i32_0 : i32
    scf.if %2 {
      %cst_100 = arith.constant 0.000000e+00 : bf16
      %194 = vector.broadcast %cst_100 : bf16 to vector<16x128xbf16>
      %c0_101 = arith.constant 0 : index
      %c0_102 = arith.constant 0 : index
      %195 = vector.load %arg6[%c0_101, %c0_102] : memref<16x128xbf16, #tpu.memory_space<vmem>>, vector<16x128xbf16>
      tpu.vector_store %arg6[%c0_101, %c0_102], %194 {strides = array<i32>} : memref<16x128xbf16, #tpu.memory_space<vmem>>, vector<16x128xbf16>,
      %cst_103 = arith.constant 0.000000e+00 : f32
      %196 = vector.broadcast %cst_103 : f32 to vector<16x128xf32>
      %c0_104 = arith.constant 0 : index
      %c0_105 = arith.constant 0 : index
      %197 = vector.load %arg7[%c0_104, %c0_105] : memref<16x128xf32, #tpu.memory_space<vmem>>, vector<16x128xf32>
      tpu.vector_store %arg7[%c0_104, %c0_105], %196 {strides = array<i32>} : memref<16x128xf32, #tpu.memory_space<vmem>>, vector<16x128xf32>,
    } else {
    }
    %c0_i32_1 = arith.constant 0 : i32
    %c16_i32 = arith.constant 16 : i32
    %3 = arith.muli %c0_i32_1, %c16_i32 : i32
    %4 = tpu.assume_multiple %3, 16 : i32
    %5 = arith.index_cast %4 : i32 to index
    %c0 = arith.constant 0 : index
    %6 = vector.load %arg1[%5, %c0] : memref<64x512xbf16, #tpu.memory_space<vmem>>, vector<16x512xbf16>
    %7 = arith.extf %6 : vector<16x512xbf16> to vector<16x512xf32>
    %c0_2 = arith.constant 0 : index
    %c0_3 = arith.constant 0 : index
    %8 = vector.load %arg6[%c0_2, %c0_3] : memref<16x128xbf16, #tpu.memory_space<vmem>>, vector<16x128xbf16>
    %c0_4 = arith.constant 0 : index
    %c0_5 = arith.constant 0 : index
    %9 = vector.load %arg7[%c0_4, %c0_5] : memref<16x128xf32, #tpu.memory_space<vmem>>, vector<16x128xf32>
    %c0_6 = arith.constant 0 : index
    %c0_7 = arith.constant 0 : index
    %10 = vector.load %arg2[%c0_6, %c0_7] : memref<128x512xbf16, #tpu.memory_space<vmem>>, vector<128x512xbf16>
    %cst = arith.constant dense<0.000000e+00> : vector<16x512xf32>
    %11 = tpu.matmul %8, %10, %cst {dimension_numbers = #tpu.dot_dimension_numbers<[1], [0], [0], [1], [0, 0, 1, 1], [], []>} : vector<16x128xbf16>, vector<128x512xbf16>, vector<16x512xf32> -> vector<16x512xf32>
    %12 = arith.addf %7, %11 : vector<16x512xf32>
    %13 = vector.extract_strided_slice %12 {offsets = [0, 0], sizes = [16, 128], strides = [1, 1]} : vector<16x512xf32> to vector<16x128xf32>
    %cst_8 = arith.constant 5.000000e-01 : f32
    %14 = vector.broadcast %cst_8 : f32 to vector<16x128xf32>
    %15 = arith.mulf %14, %13 : vector<16x128xf32>
    %16 = math.tanh %15 : vector<16x128xf32>
    %cst_9 = arith.constant 1.000000e+00 : f32
    %17 = vector.broadcast %cst_9 : f32 to vector<16x128xf32>
    %18 = arith.addf %16, %17 : vector<16x128xf32>
    %cst_10 = arith.constant 5.000000e-01 : f32
    %19 = vector.broadcast %cst_10 : f32 to vector<16x128xf32>
    %20 = arith.mulf %19, %18 : vector<16x128xf32>
    %21 = vector.extract_strided_slice %12 {offsets = [0, 128], sizes = [16, 128], strides = [1, 1]} : vector<16x512xf32> to vector<16x128xf32>
    %cst_11 = arith.constant 5.000000e-01 : f32
    %22 = vector.broadcast %cst_11 : f32 to vector<16x128xf32>
    %23 = arith.mulf %22, %21 : vector<16x128xf32>
    %24 = math.tanh %23 : vector<16x128xf32>
    %cst_12 = arith.constant 1.000000e+00 : f32
    %25 = vector.broadcast %cst_12 : f32 to vector<16x128xf32>
    %26 = arith.addf %24, %25 : vector<16x128xf32>
    %cst_13 = arith.constant 5.000000e-01 : f32
    %27 = vector.broadcast %cst_13 : f32 to vector<16x128xf32>
    %28 = arith.mulf %27, %26 : vector<16x128xf32>
    %29 = vector.extract_strided_slice %12 {offsets = [0, 256], sizes = [16, 128], strides = [1, 1]} : vector<16x512xf32> to vector<16x128xf32>
    %30 = math.tanh %29 : vector<16x128xf32>
    %31 = vector.extract_strided_slice %12 {offsets = [0, 384], sizes = [16, 128], strides = [1, 1]} : vector<16x512xf32> to vector<16x128xf32>
    %cst_14 = arith.constant 5.000000e-01 : f32
    %32 = vector.broadcast %cst_14 : f32 to vector<16x128xf32>
    %33 = arith.mulf %32, %31 : vector<16x128xf32>
    %34 = math.tanh %33 : vector<16x128xf32>
    %cst_15 = arith.constant 1.000000e+00 : f32
    %35 = vector.broadcast %cst_15 : f32 to vector<16x128xf32>
    %36 = arith.addf %34, %35 : vector<16x128xf32>
    %cst_16 = arith.constant 5.000000e-01 : f32
    %37 = vector.broadcast %cst_16 : f32 to vector<16x128xf32>
    %38 = arith.mulf %37, %36 : vector<16x128xf32>
    %39 = arith.mulf %28, %9 : vector<16x128xf32>
    %40 = arith.mulf %20, %30 : vector<16x128xf32>
    %41 = arith.addf %39, %40 : vector<16x128xf32>
    %42 = math.tanh %41 : vector<16x128xf32>
    %43 = arith.mulf %38, %42 : vector<16x128xf32>
    %44 = arith.truncf %43 : vector<16x128xf32> to vector<16x128xbf16>
    %c0_17 = arith.constant 0 : index
    %c0_18 = arith.constant 0 : index
    %45 = vector.load %arg6[%c0_17, %c0_18] : memref<16x128xbf16, #tpu.memory_space<vmem>>, vector<16x128xbf16>
    tpu.vector_store %arg6[%c0_17, %c0_18], %44 {strides = array<i32>} : memref<16x128xbf16, #tpu.memory_space<vmem>>, vector<16x128xbf16>,
    %c0_19 = arith.constant 0 : index
    %c0_20 = arith.constant 0 : index
    %46 = vector.load %arg7[%c0_19, %c0_20] : memref<16x128xf32, #tpu.memory_space<vmem>>, vector<16x128xf32>
    tpu.vector_store %arg7[%c0_19, %c0_20], %41 {strides = array<i32>} : memref<16x128xf32, #tpu.memory_space<vmem>>, vector<16x128xf32>,
    %47 = arith.index_cast %4 : i32 to index
    %c0_21 = arith.constant 0 : index
    %48 = vector.load %arg8[%47, %c0_21] : memref<64x128xbf16, #tpu.memory_space<vmem>>, vector<16x128xbf16>
    tpu.vector_store %arg8[%47, %c0_21], %44 {strides = array<i32>} : memref<64x128xbf16, #tpu.memory_space<vmem>>, vector<16x128xbf16>,
    %c1_i32 = arith.constant 1 : i32
    %c16_i32_22 = arith.constant 16 : i32
    %49 = arith.muli %c1_i32, %c16_i32_22 : i32
    %50 = tpu.assume_multiple %49, 16 : i32
    %51 = arith.index_cast %50 : i32 to index
    %c0_23 = arith.constant 0 : index
    %52 = vector.load %arg1[%51, %c0_23] : memref<64x512xbf16, #tpu.memory_space<vmem>>, vector<16x512xbf16>
    %53 = arith.extf %52 : vector<16x512xbf16> to vector<16x512xf32>
    %c0_24 = arith.constant 0 : index
    %c0_25 = arith.constant 0 : index
    %54 = vector.load %arg6[%c0_24, %c0_25] : memref<16x128xbf16, #tpu.memory_space<vmem>>, vector<16x128xbf16>
    %c0_26 = arith.constant 0 : index
    %c0_27 = arith.constant 0 : index
    %55 = vector.load %arg7[%c0_26, %c0_27] : memref<16x128xf32, #tpu.memory_space<vmem>>, vector<16x128xf32>
    %c0_28 = arith.constant 0 : index
    %c0_29 = arith.constant 0 : index
    %56 = vector.load %arg2[%c0_28, %c0_29] : memref<128x512xbf16, #tpu.memory_space<vmem>>, vector<128x512xbf16>
    %cst_30 = arith.constant dense<0.000000e+00> : vector<16x512xf32>
    %57 = tpu.matmul %54, %56, %cst_30 {dimension_numbers = #tpu.dot_dimension_numbers<[1], [0], [0], [1], [0, 0, 1, 1], [], []>} : vector<16x128xbf16>, vector<128x512xbf16>, vector<16x512xf32> -> vector<16x512xf32>
    %58 = arith.addf %53, %57 : vector<16x512xf32>
    %59 = vector.extract_strided_slice %58 {offsets = [0, 0], sizes = [16, 128], strides = [1, 1]} : vector<16x512xf32> to vector<16x128xf32>
    %cst_31 = arith.constant 5.000000e-01 : f32
    %60 = vector.broadcast %cst_31 : f32 to vector<16x128xf32>
    %61 = arith.mulf %60, %59 : vector<16x128xf32>
    %62 = math.tanh %61 : vector<16x128xf32>
    %cst_32 = arith.constant 1.000000e+00 : f32
    %63 = vector.broadcast %cst_32 : f32 to vector<16x128xf32>
    %64 = arith.addf %62, %63 : vector<16x128xf32>
    %cst_33 = arith.constant 5.000000e-01 : f32
    %65 = vector.broadcast %cst_33 : f32 to vector<16x128xf32>
    %66 = arith.mulf %65, %64 : vector<16x128xf32>
    %67 = vector.extract_strided_slice %58 {offsets = [0, 128], sizes = [16, 128], strides = [1, 1]} : vector<16x512xf32> to vector<16x128xf32>
    %cst_34 = arith.constant 5.000000e-01 : f32
    %68 = vector.broadcast %cst_34 : f32 to vector<16x128xf32>
    %69 = arith.mulf %68, %67 : vector<16x128xf32>
    %70 = math.tanh %69 : vector<16x128xf32>
    %cst_35 = arith.constant 1.000000e+00 : f32
    %71 = vector.broadcast %cst_35 : f32 to vector<16x128xf32>
    %72 = arith.addf %70, %71 : vector<16x128xf32>
    %cst_36 = arith.constant 5.000000e-01 : f32
    %73 = vector.broadcast %cst_36 : f32 to vector<16x128xf32>
    %74 = arith.mulf %73, %72 : vector<16x128xf32>
    %75 = vector.extract_strided_slice %58 {offsets = [0, 256], sizes = [16, 128], strides = [1, 1]} : vector<16x512xf32> to vector<16x128xf32>
    %76 = math.tanh %75 : vector<16x128xf32>
    %77 = vector.extract_strided_slice %58 {offsets = [0, 384], sizes = [16, 128], strides = [1, 1]} : vector<16x512xf32> to vector<16x128xf32>
    %cst_37 = arith.constant 5.000000e-01 : f32
    %78 = vector.broadcast %cst_37 : f32 to vector<16x128xf32>
    %79 = arith.mulf %78, %77 : vector<16x128xf32>
    %80 = math.tanh %79 : vector<16x128xf32>
    %cst_38 = arith.constant 1.000000e+00 : f32
    %81 = vector.broadcast %cst_38 : f32 to vector<16x128xf32>
    %82 = arith.addf %80, %81 : vector<16x128xf32>
    %cst_39 = arith.constant 5.000000e-01 : f32
    %83 = vector.broadcast %cst_39 : f32 to vector<16x128xf32>
    %84 = arith.mulf %83, %82 : vector<16x128xf32>
    %85 = arith.mulf %74, %55 : vector<16x128xf32>
    %86 = arith.mulf %66, %76 : vector<16x128xf32>
    %87 = arith.addf %85, %86 : vector<16x128xf32>
    %88 = math.tanh %87 : vector<16x128xf32>
    %89 = arith.mulf %84, %88 : vector<16x128xf32>
    %90 = arith.truncf %89 : vector<16x128xf32> to vector<16x128xbf16>
    %c0_40 = arith.constant 0 : index
    %c0_41 = arith.constant 0 : index
    %91 = vector.load %arg6[%c0_40, %c0_41] : memref<16x128xbf16, #tpu.memory_space<vmem>>, vector<16x128xbf16>
    tpu.vector_store %arg6[%c0_40, %c0_41], %90 {strides = array<i32>} : memref<16x128xbf16, #tpu.memory_space<vmem>>, vector<16x128xbf16>,
    %c0_42 = arith.constant 0 : index
    %c0_43 = arith.constant 0 : index
    %92 = vector.load %arg7[%c0_42, %c0_43] : memref<16x128xf32, #tpu.memory_space<vmem>>, vector<16x128xf32>
    tpu.vector_store %arg7[%c0_42, %c0_43], %87 {strides = array<i32>} : memref<16x128xf32, #tpu.memory_space<vmem>>, vector<16x128xf32>,
    %93 = arith.index_cast %50 : i32 to index
    %c0_44 = arith.constant 0 : index
    %94 = vector.load %arg8[%93, %c0_44] : memref<64x128xbf16, #tpu.memory_space<vmem>>, vector<16x128xbf16>
    tpu.vector_store %arg8[%93, %c0_44], %90 {strides = array<i32>} : memref<64x128xbf16, #tpu.memory_space<vmem>>, vector<16x128xbf16>,
    %c2_i32 = arith.constant 2 : i32
    %c16_i32_45 = arith.constant 16 : i32
    %95 = arith.muli %c2_i32, %c16_i32_45 : i32
    %96 = tpu.assume_multiple %95, 16 : i32
    %97 = arith.index_cast %96 : i32 to index
    %c0_46 = arith.constant 0 : index
    %98 = vector.load %arg1[%97, %c0_46] : memref<64x512xbf16, #tpu.memory_space<vmem>>, vector<16x512xbf16>
    %99 = arith.extf %98 : vector<16x512xbf16> to vector<16x512xf32>
    %c0_47 = arith.constant 0 : index
    %c0_48 = arith.constant 0 : index
    %100 = vector.load %arg6[%c0_47, %c0_48] : memref<16x128xbf16, #tpu.memory_space<vmem>>, vector<16x128xbf16>
    %c0_49 = arith.constant 0 : index
    %c0_50 = arith.constant 0 : index
    %101 = vector.load %arg7[%c0_49, %c0_50] : memref<16x128xf32, #tpu.memory_space<vmem>>, vector<16x128xf32>
    %c0_51 = arith.constant 0 : index
    %c0_52 = arith.constant 0 : index
    %102 = vector.load %arg2[%c0_51, %c0_52] : memref<128x512xbf16, #tpu.memory_space<vmem>>, vector<128x512xbf16>
    %cst_53 = arith.constant dense<0.000000e+00> : vector<16x512xf32>
    %103 = tpu.matmul %100, %102, %cst_53 {dimension_numbers = #tpu.dot_dimension_numbers<[1], [0], [0], [1], [0, 0, 1, 1], [], []>} : vector<16x128xbf16>, vector<128x512xbf16>, vector<16x512xf32> -> vector<16x512xf32>
    %104 = arith.addf %99, %103 : vector<16x512xf32>
    %105 = vector.extract_strided_slice %104 {offsets = [0, 0], sizes = [16, 128], strides = [1, 1]} : vector<16x512xf32> to vector<16x128xf32>
    %cst_54 = arith.constant 5.000000e-01 : f32
    %106 = vector.broadcast %cst_54 : f32 to vector<16x128xf32>
    %107 = arith.mulf %106, %105 : vector<16x128xf32>
    %108 = math.tanh %107 : vector<16x128xf32>
    %cst_55 = arith.constant 1.000000e+00 : f32
    %109 = vector.broadcast %cst_55 : f32 to vector<16x128xf32>
    %110 = arith.addf %108, %109 : vector<16x128xf32>
    %cst_56 = arith.constant 5.000000e-01 : f32
    %111 = vector.broadcast %cst_56 : f32 to vector<16x128xf32>
    %112 = arith.mulf %111, %110 : vector<16x128xf32>
    %113 = vector.extract_strided_slice %104 {offsets = [0, 128], sizes = [16, 128], strides = [1, 1]} : vector<16x512xf32> to vector<16x128xf32>
    %cst_57 = arith.constant 5.000000e-01 : f32
    %114 = vector.broadcast %cst_57 : f32 to vector<16x128xf32>
    %115 = arith.mulf %114, %113 : vector<16x128xf32>
    %116 = math.tanh %115 : vector<16x128xf32>
    %cst_58 = arith.constant 1.000000e+00 : f32
    %117 = vector.broadcast %cst_58 : f32 to vector<16x128xf32>
    %118 = arith.addf %116, %117 : vector<16x128xf32>
    %cst_59 = arith.constant 5.000000e-01 : f32
    %119 = vector.broadcast %cst_59 : f32 to vector<16x128xf32>
    %120 = arith.mulf %119, %118 : vector<16x128xf32>
    %121 = vector.extract_strided_slice %104 {offsets = [0, 256], sizes = [16, 128], strides = [1, 1]} : vector<16x512xf32> to vector<16x128xf32>
    %122 = math.tanh %121 : vector<16x128xf32>
    %123 = vector.extract_strided_slice %104 {offsets = [0, 384], sizes = [16, 128], strides = [1, 1]} : vector<16x512xf32> to vector<16x128xf32>
    %cst_60 = arith.constant 5.000000e-01 : f32
    %124 = vector.broadcast %cst_60 : f32 to vector<16x128xf32>
    %125 = arith.mulf %124, %123 : vector<16x128xf32>
    %126 = math.tanh %125 : vector<16x128xf32>
    %cst_61 = arith.constant 1.000000e+00 : f32
    %127 = vector.broadcast %cst_61 : f32 to vector<16x128xf32>
    %128 = arith.addf %126, %127 : vector<16x128xf32>
    %cst_62 = arith.constant 5.000000e-01 : f32
    %129 = vector.broadcast %cst_62 : f32 to vector<16x128xf32>
    %130 = arith.mulf %129, %128 : vector<16x128xf32>
    %131 = arith.mulf %120, %101 : vector<16x128xf32>
    %132 = arith.mulf %112, %122 : vector<16x128xf32>
    %133 = arith.addf %131, %132 : vector<16x128xf32>
    %134 = math.tanh %133 : vector<16x128xf32>
    %135 = arith.mulf %130, %134 : vector<16x128xf32>
    %136 = arith.truncf %135 : vector<16x128xf32> to vector<16x128xbf16>
    %c0_63 = arith.constant 0 : index
    %c0_64 = arith.constant 0 : index
    %137 = vector.load %arg6[%c0_63, %c0_64] : memref<16x128xbf16, #tpu.memory_space<vmem>>, vector<16x128xbf16>
    tpu.vector_store %arg6[%c0_63, %c0_64], %136 {strides = array<i32>} : memref<16x128xbf16, #tpu.memory_space<vmem>>, vector<16x128xbf16>,
    %c0_65 = arith.constant 0 : index
    %c0_66 = arith.constant 0 : index
    %138 = vector.load %arg7[%c0_65, %c0_66] : memref<16x128xf32, #tpu.memory_space<vmem>>, vector<16x128xf32>
    tpu.vector_store %arg7[%c0_65, %c0_66], %133 {strides = array<i32>} : memref<16x128xf32, #tpu.memory_space<vmem>>, vector<16x128xf32>,
    %139 = arith.index_cast %96 : i32 to index
    %c0_67 = arith.constant 0 : index
    %140 = vector.load %arg8[%139, %c0_67] : memref<64x128xbf16, #tpu.memory_space<vmem>>, vector<16x128xbf16>
    tpu.vector_store %arg8[%139, %c0_67], %136 {strides = array<i32>} : memref<64x128xbf16, #tpu.memory_space<vmem>>, vector<16x128xbf16>,
    %c3_i32 = arith.constant 3 : i32
    %c16_i32_68 = arith.constant 16 : i32
    %141 = arith.muli %c3_i32, %c16_i32_68 : i32
    %142 = tpu.assume_multiple %141, 16 : i32
    %143 = arith.index_cast %142 : i32 to index
    %c0_69 = arith.constant 0 : index
    %144 = vector.load %arg1[%143, %c0_69] : memref<64x512xbf16, #tpu.memory_space<vmem>>, vector<16x512xbf16>
    %145 = arith.extf %144 : vector<16x512xbf16> to vector<16x512xf32>
    %c0_70 = arith.constant 0 : index
    %c0_71 = arith.constant 0 : index
    %146 = vector.load %arg6[%c0_70, %c0_71] : memref<16x128xbf16, #tpu.memory_space<vmem>>, vector<16x128xbf16>
    %c0_72 = arith.constant 0 : index
    %c0_73 = arith.constant 0 : index
    %147 = vector.load %arg7[%c0_72, %c0_73] : memref<16x128xf32, #tpu.memory_space<vmem>>, vector<16x128xf32>
    %c0_74 = arith.constant 0 : index
    %c0_75 = arith.constant 0 : index
    %148 = vector.load %arg2[%c0_74, %c0_75] : memref<128x512xbf16, #tpu.memory_space<vmem>>, vector<128x512xbf16>
    %cst_76 = arith.constant dense<0.000000e+00> : vector<16x512xf32>
    %149 = tpu.matmul %146, %148, %cst_76 {dimension_numbers = #tpu.dot_dimension_numbers<[1], [0], [0], [1], [0, 0, 1, 1], [], []>} : vector<16x128xbf16>, vector<128x512xbf16>, vector<16x512xf32> -> vector<16x512xf32>
    %150 = arith.addf %145, %149 : vector<16x512xf32>
    %151 = vector.extract_strided_slice %150 {offsets = [0, 0], sizes = [16, 128], strides = [1, 1]} : vector<16x512xf32> to vector<16x128xf32>
    %cst_77 = arith.constant 5.000000e-01 : f32
    %152 = vector.broadcast %cst_77 : f32 to vector<16x128xf32>
    %153 = arith.mulf %152, %151 : vector<16x128xf32>
    %154 = math.tanh %153 : vector<16x128xf32>
    %cst_78 = arith.constant 1.000000e+00 : f32
    %155 = vector.broadcast %cst_78 : f32 to vector<16x128xf32>
    %156 = arith.addf %154, %155 : vector<16x128xf32>
    %cst_79 = arith.constant 5.000000e-01 : f32
    %157 = vector.broadcast %cst_79 : f32 to vector<16x128xf32>
    %158 = arith.mulf %157, %156 : vector<16x128xf32>
    %159 = vector.extract_strided_slice %150 {offsets = [0, 128], sizes = [16, 128], strides = [1, 1]} : vector<16x512xf32> to vector<16x128xf32>
    %cst_80 = arith.constant 5.000000e-01 : f32
    %160 = vector.broadcast %cst_80 : f32 to vector<16x128xf32>
    %161 = arith.mulf %160, %159 : vector<16x128xf32>
    %162 = math.tanh %161 : vector<16x128xf32>
    %cst_81 = arith.constant 1.000000e+00 : f32
    %163 = vector.broadcast %cst_81 : f32 to vector<16x128xf32>
    %164 = arith.addf %162, %163 : vector<16x128xf32>
    %cst_82 = arith.constant 5.000000e-01 : f32
    %165 = vector.broadcast %cst_82 : f32 to vector<16x128xf32>
    %166 = arith.mulf %165, %164 : vector<16x128xf32>
    %167 = vector.extract_strided_slice %150 {offsets = [0, 256], sizes = [16, 128], strides = [1, 1]} : vector<16x512xf32> to vector<16x128xf32>
    %168 = math.tanh %167 : vector<16x128xf32>
    %169 = vector.extract_strided_slice %150 {offsets = [0, 384], sizes = [16, 128], strides = [1, 1]} : vector<16x512xf32> to vector<16x128xf32>
    %cst_83 = arith.constant 5.000000e-01 : f32
    %170 = vector.broadcast %cst_83 : f32 to vector<16x128xf32>
    %171 = arith.mulf %170, %169 : vector<16x128xf32>
    %172 = math.tanh %171 : vector<16x128xf32>
    %cst_84 = arith.constant 1.000000e+00 : f32
    %173 = vector.broadcast %cst_84 : f32 to vector<16x128xf32>
    %174 = arith.addf %172, %173 : vector<16x128xf32>
    %cst_85 = arith.constant 5.000000e-01 : f32
    %175 = vector.broadcast %cst_85 : f32 to vector<16x128xf32>
    %176 = arith.mulf %175, %174 : vector<16x128xf32>
    %177 = arith.mulf %166, %147 : vector<16x128xf32>
    %178 = arith.mulf %158, %168 : vector<16x128xf32>
    %179 = arith.addf %177, %178 : vector<16x128xf32>
    %180 = math.tanh %179 : vector<16x128xf32>
    %181 = arith.mulf %176, %180 : vector<16x128xf32>
    %182 = arith.truncf %181 : vector<16x128xf32> to vector<16x128xbf16>
    %c0_86 = arith.constant 0 : index
    %c0_87 = arith.constant 0 : index
    %183 = vector.load %arg6[%c0_86, %c0_87] : memref<16x128xbf16, #tpu.memory_space<vmem>>, vector<16x128xbf16>
    tpu.vector_store %arg6[%c0_86, %c0_87], %182 {strides = array<i32>} : memref<16x128xbf16, #tpu.memory_space<vmem>>, vector<16x128xbf16>,
    %c0_88 = arith.constant 0 : index
    %c0_89 = arith.constant 0 : index
    %184 = vector.load %arg7[%c0_88, %c0_89] : memref<16x128xf32, #tpu.memory_space<vmem>>, vector<16x128xf32>
    tpu.vector_store %arg7[%c0_88, %c0_89], %179 {strides = array<i32>} : memref<16x128xf32, #tpu.memory_space<vmem>>, vector<16x128xf32>,
    %185 = arith.index_cast %142 : i32 to index
    %c0_90 = arith.constant 0 : index
    %186 = vector.load %arg8[%185, %c0_90] : memref<64x128xbf16, #tpu.memory_space<vmem>>, vector<16x128xbf16>
    tpu.vector_store %arg8[%185, %c0_90], %182 {strides = array<i32>} : memref<64x128xbf16, #tpu.memory_space<vmem>>, vector<16x128xbf16>,
    %c4_i32 = arith.constant 4 : i32
    %c0_91 = arith.constant 0 : index
    %c0_92 = arith.constant 0 : index
    %187 = vector.load %arg8[%c0_91, %c0_92] : memref<64x128xbf16, #tpu.memory_space<vmem>>, vector<64x128xbf16>
    %c0_93 = arith.constant 0 : index
    %c0_94 = arith.constant 0 : index
    %188 = vector.load %arg3[%c0_93, %c0_94] : memref<128x128xbf16, #tpu.memory_space<vmem>>, vector<128x128xbf16>
    %cst_95 = arith.constant dense<0.000000e+00> : vector<64x128xf32>
    %189 = tpu.matmul %187, %188, %cst_95 {dimension_numbers = #tpu.dot_dimension_numbers<[1], [0], [0], [1], [0, 0, 1, 1], [], []>} : vector<64x128xbf16>, vector<128x128xbf16>, vector<64x128xf32> -> vector<64x128xf32>
    %c0_96 = arith.constant 0 : index
    %c0_97 = arith.constant 0 : index
    %190 = vector.load %arg4[%c0_96, %c0_97] : memref<1x128xf32, #tpu.memory_space<vmem>>, vector<1x128xf32>
    %191 = vector.broadcast %190 : vector<1x128xf32> to vector<64x128xf32>
    %192 = arith.addf %189, %191 : vector<64x128xf32>
    %c0_98 = arith.constant 0 : index
    %c0_99 = arith.constant 0 : index
    %193 = vector.load %arg5[%c0_98, %c0_99] : memref<64x128xf32, #tpu.memory_space<vmem>>, vector<64x128xf32>
    tpu.vector_store %arg5[%c0_98, %c0_99], %192 {strides = array<i32>} : memref<64x128xf32, #tpu.memory_space<vmem>>, vector<64x128xf32>,
    return
  }
  func.func @transform_0(%arg0: i32) -> (i32, i32) {
    %c0_i32 = arith.constant 0 : i32
    %c0_i32_0 = arith.constant 0 : i32
    return %arg0, %c0_i32 : i32, i32
  }
  func.func @transform_1(%arg0: i32) -> (i32, i32) {
    %c0_i32 = arith.constant 0 : i32
    %c0_i32_0 = arith.constant 0 : i32
    %c0_i32_1 = arith.constant 0 : i32
    return %c0_i32, %c0_i32_0 : i32, i32
  }
  func.func @transform_2(%arg0: i32) -> (i32, i32) {
    %c0_i32 = arith.constant 0 : i32
    %c0_i32_0 = arith.constant 0 : i32
    %c0_i32_1 = arith.constant 0 : i32
    return %c0_i32, %c0_i32_0 : i32, i32
  }
  func.func @transform_3(%arg0: i32) -> (i32, i32) {
    %c0_i32 = arith.constant 0 : i32
    %c0_i32_0 = arith.constant 0 : i32
    %c0_i32_1 = arith.constant 0 : i32
    return %c0_i32, %c0_i32_0 : i32, i32
  }
  func.func @transform_4(%arg0: i32) -> (i32, i32) {
    %c0_i32 = arith.constant 0 : i32
    %c0_i32_0 = arith.constant 0 : i32
    return %arg0, %c0_i32 : i32, i32
  }
}

</mosaic_0001>

<bundles_post_ra>
// kernel: my_lstm_forward.1
= control target key start
LH: loop header
LB: loop body
LE: loop exit
PB: predicated region body
PF: predicated region fallthrough
CT: control target
= control target key end

     0   :  { %s2208_s15 = smov 0   ;;  %s2641_s0 = inlined_call_operand.vmem [shape: bf16[128,512], index: 0, kind: input, shape index: {}]   ;;  %s2642_s1 = inlined_call_operand.vmem [shape: bf16[128,512], index: 1, kind: input, shape index: {}]   ;;  %s2643_s2 = inlined_call_operand.vmem [shape: bf16[128,128], index: 2, kind: input, shape index: {}]   ;;  %s2644_s3 = inlined_call_operand.vmem [shape: f32[1,128], index: 3, kind: input, shape index: {}]   ;;  %s2645_s4 = inlined_call_operand.vmem [shape: f32[128,128], index: 4, kind: output, shape index: {}]  }
   0x1 LB: > { %s1802_s16 = sadd.s32 4294967295, %s2178_s15   ;;  %p1806_p0 = scmp.ge.s32.totalorder %s2178_s15, 1  ;;  %s2178_s15 = sphi %s2208_s15, %s14_s15  }
   0x2   : > { %p164_p1 = scmp.lt.s32.totalorder %s2178_s15, 3 }
   0x4   : > { %p165_p2 = pnand %p1806_p0, %p164_p1 }
   0x5   : > { %s1807_s17 = sshll.u32 (!%p165_p2), %s1802_s16, 3  ;;  %p1812_p4 = scmp.ne.s32.totalorder (!%p165_p2), %s1802_s16, 0 }
   0x6   : > { %168 = sbr.rel (%p165_p2) target bundleno = 1312 (0x520), region = 36  ;;  %p192_p3 = scmp.lt.s32.totalorder (!%p165_p2), %s1807_s17, 15 }
   0xd   : > { %s2647_s17 = smov (!%p192_p3, %s1807_s17), 15  ;;  %208 = sbr.rel (%p1812_p4) target bundleno = 20 (0x14), region = 40 }
   0xe   : > { %s1964_s18 = sshll.u32 %s2647_s17, 4  ;;  %s1811_s19 = sshll.u32 %s2647_s17, 3  ;;  %v2180_v0 = vmov (!%p1812_p4), 0   ;;  %v2181_v1 = vmov (!%p1812_p4), 0.0  }
   0xf   : > { %s2219_s22 = scalar_lea.vmem %s2641_s0, %s1964_s18  ;;  %s2224_s25 = scalar_lea.vmem %s2645_s4, %s1811_s19  ;;  %209 = vst [vmem:[#allocation2] sm:$0xff] (!%p1812_p4), %v2180_v0  ;;  %210 = vst [vmem:[#allocation3] sm:$0xff] (!%p1812_p4), %v2181_v1 }
  0x10   : > { %211 = vst [vmem:[#allocation3 + $0x8] sm:$0xff] (!%p1812_p4), %v2181_v1 }
  0x14 PF: > { %v2012_v2 = vld [vmem:[%s2642_s1 + $0x4] ss:$16 sps:$4 sm:$0xff]   ;;  %v2232_v3 = vld [vmem:[%s2642_s1] ss:$16 sps:$4 sm:$0xff]   ;;  %v2182_v4 = vmov 0   ;;  %v216_v54 = vld [vmem:[%s2219_s22 + $0x8] sm:$0xff] }
  0x15   : > { %454 = vmatprep.mubr.bf16.mxu1 %v2182_v4  ;;  %799 = vmatprep.mubr.bf16.mxu0 %v2182_v4  ;;  %v2239_v5 = vld [vmem:[%s2642_s1 + $0x24] ss:$16 sps:$4 sm:$0xff]   ;;  %v2245_v6 = vld [vmem:[%s2642_s1 + $0x20] ss:$16 sps:$4 sm:$0xff]   ;;  %v2333_v19 = vld [vmem:[%s2642_s1 + $0xc] ss:$16 sps:$4 sm:$0xff]   ;;  %v221_v56 = vunpack.c.l.bf16 %v216_v54  ;;  %v222_v57 = vunpack.c.h.bf16 %v216_v54 }
  0x16   : > { %422 = vmatprep.subr.bf16.mxu1 %v2012_v2  ;;  %767 = vmatprep.subr.bf16.mxu0 %v2012_v2  ;;  %v2252_v7 = vld [vmem:[%s2642_s1 + $0x44] ss:$16 sps:$4 sm:$0xff]   ;;  %v2259_v8 = vld [vmem:[%s2642_s1 + $0x40] ss:$16 sps:$4 sm:$0xff]   ;;  %v2342_v21 = vld [vmem:[%s2642_s1 + $0x8] ss:$16 sps:$4 sm:$0xff]  }
  0x17   : > { %423 = vmatpush1.bf16.msra.mxu1 %v2232_v3  ;;  %768 = vmatpush1.bf16.msra.mxu0 %v2232_v3  ;;  %v2266_v9 = vld [vmem:[%s2642_s1 + $0x64] ss:$16 sps:$4 sm:$0xff]   ;;  %v2273_v10 = vld [vmem:[%s2642_s1 + $0x60] ss:$16 sps:$4 sm:$0xff]   ;;  %v2350_v22 = vld [vmem:[%s2642_s1 + $0x2c] ss:$16 sps:$4 sm:$0xff]  }
  0x18   : > { %424 = vmatprep.subr.bf16.mxu1 %v2239_v5  ;;  %769 = vmatprep.subr.bf16.mxu0 %v2239_v5  ;;  %v2280_v11 = vld [vmem:[%s2642_s1 + $0x84] ss:$16 sps:$4 sm:$0xff]   ;;  %v2287_v12 = vld [vmem:[%s2642_s1 + $0x80] ss:$16 sps:$4 sm:$0xff]   ;;  %v2356_v23 = vld [vmem:[%s2642_s1 + $0x28] ss:$16 sps:$4 sm:$0xff]  }
  0x19   : > { %v2294_v13 = vld [vmem:[%s2642_s1 + $0xa4] ss:$16 sps:$4 sm:$0xff]   ;;  %v2301_v14 = vld [vmem:[%s2642_s1 + $0xa0] ss:$16 sps:$4 sm:$0xff]   ;;  %v2363_v24 = vld [vmem:[%s2642_s1 + $0x4c] ss:$16 sps:$4 sm:$0xff]  }
  0x1a   : > { %v2308_v15 = vld [vmem:[%s2642_s1 + $0xc4] ss:$16 sps:$4 sm:$0xff]   ;;  %v2314_v16 = vld [vmem:[%s2642_s1 + $0xc0] ss:$16 sps:$4 sm:$0xff]   ;;  %v2369_v25 = vld [vmem:[%s2642_s1 + $0x48] ss:$16 sps:$4 sm:$0xff]  }
  0x1b   : > { %425 = vmatpush1.bf16.msra.mxu1 %v2245_v6  ;;  %770 = vmatpush1.bf16.msra.mxu0 %v2245_v6  ;;  %v2319_v17 = vld [vmem:[%s2642_s1 + $0xe4] ss:$16 sps:$4 sm:$0xff]   ;;  %v2328_v18 = vld [vmem:[%s2642_s1 + $0xe0] ss:$16 sps:$4 sm:$0xff]   ;;  %v2375_v26 = vld [vmem:[%s2642_s1 + $0x6c] ss:$16 sps:$4 sm:$0xff]  }
  0x1c   : > { %426 = vmatprep.subr.bf16.mxu1 %v2252_v7  ;;  %771 = vmatprep.subr.bf16.mxu0 %v2252_v7  ;;  %v227_v20 = vld [vmem:[#allocation2] sm:$0xff]  ;;  %v2381_v27 = vld [vmem:[%s2642_s1 + $0x68] ss:$16 sps:$4 sm:$0xff]   ;;  %v2387_v28 = vld [vmem:[%s2642_s1 + $0x8c] ss:$16 sps:$4 sm:$0xff]  }
  0x1d   : > { %v2393_v29 = vld [vmem:[%s2642_s1 + $0x88] ss:$16 sps:$4 sm:$0xff]   ;;  %v2399_v30 = vld [vmem:[%s2642_s1 + $0xac] ss:$16 sps:$4 sm:$0xff]   ;;  %v215_v40 = vld [vmem:[%s2219_s22] sm:$0xff] }
  0x1e   : > { %v2405_v31 = vld [vmem:[%s2642_s1 + $0xa8] ss:$16 sps:$4 sm:$0xff]   ;;  %v2411_v32 = vld [vmem:[%s2642_s1 + $0xcc] ss:$16 sps:$4 sm:$0xff]   ;;  %v217_v41 = vld [vmem:[%s2219_s22 + $0x10] sm:$0xff]  ;;  %v220_v42 = vunpack.c.h.bf16 %v215_v40  ;;  %v219_v43 = vunpack.c.l.bf16 %v215_v40 }
  0x1f   : > { %427 = vmatpush1.bf16.msra.mxu1 %v2259_v8  ;;  %772 = vmatpush1.bf16.msra.mxu0 %v2259_v8  ;;  %v2417_v33 = vld [vmem:[%s2642_s1 + $0xc8] ss:$16 sps:$4 sm:$0xff]   ;;  %v2423_v34 = vld [vmem:[%s2642_s1 + $0xec] ss:$16 sps:$4 sm:$0xff]   ;;  %v224_v44 = vunpack.c.h.bf16 %v217_v41  ;;  %v223_v46 = vunpack.c.l.bf16 %v217_v41 }
  0x20   : > { %428 = vmatprep.subr.bf16.mxu1 %v2266_v9  ;;  %773 = vmatprep.subr.bf16.mxu0 %v2266_v9  ;;  %v2429_v35 = vld [vmem:[%s2642_s1 + $0xe8] ss:$16 sps:$4 sm:$0xff]  }
  0x21   : > { %v218_v55 = vld [vmem:[%s2219_s22 + $0x18] sm:$0xff] }
  0x22   : > { %v225_v58 = vunpack.c.l.bf16 %v218_v55  ;;  %v226_v60 = vunpack.c.h.bf16 %v218_v55 }
  0x23   : > { %429 = vmatpush1.bf16.msra.mxu1 %v2273_v10  ;;  %774 = vmatpush1.bf16.msra.mxu0 %v2273_v10 }
  0x24   : > { %430 = vmatprep.subr.bf16.mxu1 %v2280_v11  ;;  %775 = vmatprep.subr.bf16.mxu0 %v2280_v11 }
  0x27   : > { %431 = vmatpush1.bf16.msra.mxu1 %v2287_v12  ;;  %776 = vmatpush1.bf16.msra.mxu0 %v2287_v12 }
  0x28   : > { %432 = vmatprep.subr.bf16.mxu1 %v2294_v13  ;;  %777 = vmatprep.subr.bf16.mxu0 %v2294_v13 }
  0x2b   : > { %433 = vmatpush1.bf16.msra.mxu1 %v2301_v14  ;;  %778 = vmatpush1.bf16.msra.mxu0 %v2301_v14 }
  0x2c   : > { %434 = vmatprep.subr.bf16.mxu1 %v2308_v15  ;;  %779 = vmatprep.subr.bf16.mxu0 %v2308_v15 }
  0x2f   : > { %435 = vmatpush1.bf16.msra.mxu1 %v2314_v16  ;;  %780 = vmatpush1.bf16.msra.mxu0 %v2314_v16 }
  0x30   : > { %436 = vmatprep.subr.bf16.mxu1 %v2319_v17  ;;  %781 = vmatprep.subr.bf16.mxu0 %v2319_v17 }
  0x33   : > { %437 = vmatpush1.bf16.msra.mxu1 %v2328_v18  ;;  %782 = vmatpush1.bf16.msra.mxu0 %v2328_v18 }
  0x34   : > { %465 = vmatprep.subr.bf16.mxu1 %v2333_v19  ;;  %1113 = vmatprep.subr.bf16.mxu0 %v2012_v2 }
  0x36   : > { %455 = vmatmul.mubr.bf16.vlgmr.msra.gmra.mrb[0].mxu1 %v227_v20 }
  0x37   : > { %466 = vmatpush1.bf16.msra.mxu1 %v2342_v21  ;;  %497 = vmatprep.mubr.bf16.mxu1 %v2182_v4 }
  0x38   : > { %467 = vmatprep.subr.bf16.mxu1 %v2350_v22 }
  0x3b   : > { %468 = vmatpush1.bf16.msra.mxu1 %v2356_v23 }
  0x3c   : > { %469 = vmatprep.subr.bf16.mxu1 %v2363_v24 }
  0x3f   : > { %470 = vmatpush1.bf16.msra.mxu1 %v2369_v25 }
  0x40   : > { %471 = vmatprep.subr.bf16.mxu1 %v2375_v26 }
  0x43   : > { %472 = vmatpush1.bf16.msra.mxu1 %v2381_v27 }
  0x44   : > { %473 = vmatprep.subr.bf16.mxu1 %v2387_v28 }
  0x47   : > { %474 = vmatpush1.bf16.msra.mxu1 %v2393_v29 }
  0x48   : > { %475 = vmatprep.subr.bf16.mxu1 %v2399_v30 }
  0x4b   : > { %476 = vmatpush1.bf16.msra.mxu1 %v2405_v31 }
  0x4c   : > { %477 = vmatprep.subr.bf16.mxu1 %v2411_v32 }
  0x4f   : > { %478 = vmatpush1.bf16.msra.mxu1 %v2417_v33 }
  0x50   : > { %479 = vmatprep.subr.bf16.mxu1 %v2423_v34 }
  0x53   : > { %480 = vmatpush1.bf16.msra.mxu1 %v2429_v35 }
  0x54   : > { %810 = vmatprep.subr.bf16.mxu1 %v2333_v19 }
  0x56   : > { %498 = vmatmul.mubr.bf16.vlgmr.msra.gmra.mrb[4].mxu1 %v227_v20 }
  0x57   : > { %811 = vmatpush1.bf16.msra.mxu1 %v2342_v21  ;;  %842 = vmatprep.mubr.bf16.mxu1 %v2182_v4 }
  0x58   : > { %812 = vmatprep.subr.bf16.mxu1 %v2350_v22 }
  0x5b   : > { %813 = vmatpush1.bf16.msra.mxu1 %v2356_v23 }
  0x5c   : > { %814 = vmatprep.subr.bf16.mxu1 %v2363_v24 }
  0x5f   : > { %815 = vmatpush1.bf16.msra.mxu1 %v2369_v25 }
  0x60   : > { %816 = vmatprep.subr.bf16.mxu1 %v2375_v26 }
  0x63   : > { %817 = vmatpush1.bf16.msra.mxu1 %v2381_v27 }
  0x64   : > { %818 = vmatprep.subr.bf16.mxu1 %v2387_v28 }
  0x67   : > { %819 = vmatpush1.bf16.msra.mxu1 %v2393_v29 }
  0x68   : > { %820 = vmatprep.subr.bf16.mxu1 %v2399_v30 }
  0x6b   : > { %821 = vmatpush1.bf16.msra.mxu1 %v2405_v31 }
  0x6c   : > { %822 = vmatprep.subr.bf16.mxu1 %v2411_v32 }
  0x6f   : > { %823 = vmatpush1.bf16.msra.mxu1 %v2417_v33 }
  0x70   : > { %824 = vmatprep.subr.bf16.mxu1 %v2423_v34 }
  0x73   : > { %825 = vmatpush1.bf16.msra.mxu1 %v2429_v35 }
  0x74   : > { %1156 = vmatprep.subr.bf16.mxu1 %v2333_v19 }
 0x109   : > { %v456_v36 = vpop.f32.mrb[0].mxu1 }
 0x10a   : > { %v458_v37 = vpop.f32.mrb[1].mxu1  ;;  %v508_v47 = vadd.f32 %v456_v36, %v219_v43 }
 0x10b   : > { %v460_v38 = vpop.f32.mrb[2].mxu1  ;;  %v509_v45 = vadd.f32 %v458_v37, %v220_v42 }
 0x10c   : > { %v462_v39 = vpop.f32.mrb[3].mxu1  ;;  %v512_v50 = vadd.f32 %v460_v38, %v223_v46  ;;  %v516_v51 = vmul.f32 0.5, %v508_v47  ;;  %v228_v47 = vld [vmem:[#allocation3] sm:$0xff] }
 0x10d   : > { %v513_v48 = vadd.f32 %v462_v39, %v224_v44  ;;  %v524_v49 = vmul.f32 0.5, %v509_v45 }
 0x10e   : > { %v517_v53 = vmul.f32 0.5, %v512_v50 }
 0x10f   : > { %v525_v52 = vmul.f32 0.5, %v513_v48  ;;  %2092 = vtanh.f32 %v524_v49 }
 0x110   : > { %2094 = vtanh.f32 %v516_v51  ;;  %v229_v51 = vld [vmem:[#allocation3 + $0x8] sm:$0xff] }
 0x111   : > { %2096 = vtanh.f32 %v525_v52 }
 0x112   : > { %2098 = vtanh.f32 %v517_v53 }
 0x119   : > { %v2093_v0 = vpop.eup %2092 }
 0x11a   : > { %v2095_v36 = vpop.eup %2094  ;;  %v528_v39 = vadd.f32 1.0, %v2093_v0 }
 0x11b   : > { %v2097_v38 = vpop.eup %2096  ;;  %v520_v42 = vadd.f32 1.0, %v2095_v36 }
 0x11c   : > { %v2099_v40 = vpop.eup %2098  ;;  %v529_v43 = vadd.f32 1.0, %v2097_v38  ;;  %v530_v45 = vmul.f32 0.5, %v528_v39 }
 0x11d   : > { %v521_v46 = vadd.f32 1.0, %v2099_v40  ;;  %v522_v48 = vmul.f32 0.5, %v520_v42 }
 0x11e   : > { %v531_v49 = vmul.f32 0.5, %v529_v43  ;;  %v542_v52 = vmul.f32 %v530_v45, %v228_v47 }
 0x11f   : > { %v523_v53 = vmul.f32 0.5, %v521_v46 }
 0x129   : > { %v499_v59 = vpop.f32.mrb[4].mxu1 }
 0x12a   : > { %v510_v61 = vadd.f32 %v499_v59, %v221_v56  ;;  %v501_v62 = vpop.f32.mrb[5].mxu1  ;;  %v543_v56 = vmul.f32 %v531_v49, %v229_v51 }
 0x12b   : > { %v503_v63 = vpop.f32.mrb[6].mxu1  ;;  %v511_v1 = vadd.f32 %v501_v62, %v222_v57 }
 0x12c   : > { %2100 = vtanh.f32 %v510_v61  ;;  %v514_v2 = vadd.f32 %v503_v63, %v225_v58  ;;  %v505_v20 = vpop.f32.mrb[7].mxu1 }
 0x12d   : > { %v515_v37 = vadd.f32 %v505_v20, %v226_v60  ;;  %v534_v41 = vmul.f32 0.5, %v511_v1 }
 0x12e   : > { %2102 = vtanh.f32 %v514_v2 }
 0x12f   : > { %v535_v44 = vmul.f32 0.5, %v515_v37  ;;  %2104 = vtanh.f32 %v534_v41 }
 0x131   : > { %2106 = vtanh.f32 %v535_v44 }
 0x136   : > { %v2101_v50 = vpop.eup %2100 }
 0x137   : > { %v544_v54 = vmul.f32 %v2101_v50, %v522_v48 }
 0x138   : > { %v2103_v55 = vpop.eup %2102 }
 0x139   : > { %v2455_v57 = vadd.f32 %v544_v54, %v542_v52  ;;  %v545_v58 = vmul.f32 %v2103_v55, %v523_v53  ;;  %v2105_v60 = vpop.eup %2104 }
 0x13a   : > { %v538_v62 = vadd.f32 1.0, %v2105_v60 }
 0x13b   : > { %2108 = vtanh.f32 %v2455_v57  ;;  %v2458_v59 = vadd.f32 %v545_v58, %v543_v56  ;;  %v2107_v61 = vpop.eup %2106 }
 0x13c   : > { %v539_v63 = vadd.f32 1.0, %v2107_v61  ;;  %v540_v1 = vmul.f32 0.5, %v538_v62 }
 0x13d   : > { %2110 = vtanh.f32 %v2458_v59 }
 0x13e   : > { %v541_v2 = vmul.f32 0.5, %v539_v63 }
 0x145   : > { %v2109_v0 = vpop.eup %2108 }
 0x146   : > { %v550_v36 = vmul.f32 %v2109_v0, %v540_v1 }
 0x147   : > { %v2111_v20 = vpop.eup %2110 }
 0x148   : > { %v551_v37 = vmul.f32 %v2111_v20, %v541_v2 }
 0x14a   : > { %v2461_v38 = vpack.c.bf16 %v551_v37, %v550_v36 }
 0x14c   : > { %800 = vmatmul.mubr.bf16.vlgmr.msra.gmra.mrb[0].mxu0 %v2461_v38  ;;  %843 = vmatmul.mubr.bf16.vlgmr.msra.gmra.mrb[8].mxu1 %v2461_v38 }
 0x14d   : > { %1114 = vmatpush1.bf16.msra.mxu0 %v2232_v3  ;;  %1157 = vmatpush1.bf16.msra.mxu1 %v2342_v21  ;;  %v1845_v3 = vld [vmem:[%s2219_s22 + $0x20] sm:$0xff] }
 0x14e   : > { %1115 = vmatprep.subr.bf16.mxu0 %v2239_v5  ;;  %1158 = vmatprep.subr.bf16.mxu1 %v2350_v22  ;;  %v1847_v5 = vld [vmem:[%s2219_s22 + $0x30] sm:$0xff] }
 0x14f   : > { %1145 = vmatprep.mubr.bf16.mxu0 %v2182_v4  ;;  %1188 = vmatprep.mubr.bf16.mxu1 %v2182_v4 }
 0x151   : > { %1116 = vmatpush1.bf16.msra.mxu0 %v2245_v6  ;;  %1159 = vmatpush1.bf16.msra.mxu1 %v2356_v23  ;;  %v564_v6 = vunpack.c.l.bf16 %v1845_v3 }
 0x152   : > { %1117 = vmatprep.subr.bf16.mxu0 %v2252_v7  ;;  %1160 = vmatprep.subr.bf16.mxu1 %v2363_v24  ;;  %v1846_v7 = vld [vmem:[%s2219_s22 + $0x28] sm:$0xff] }
 0x153   : > { %v567_v50 = vunpack.c.h.bf16 %v1846_v7 }
 0x155   : > { %1118 = vmatpush1.bf16.msra.mxu0 %v2259_v8  ;;  %1161 = vmatpush1.bf16.msra.mxu1 %v2369_v25  ;;  %v565_v8 = vunpack.c.h.bf16 %v1845_v3 }
 0x156   : > { %1119 = vmatprep.subr.bf16.mxu0 %v2266_v9  ;;  %1162 = vmatprep.subr.bf16.mxu1 %v2375_v26  ;;  %v568_v9 = vunpack.c.l.bf16 %v1847_v5 }
 0x159   : > { %1120 = vmatpush1.bf16.msra.mxu0 %v2273_v10  ;;  %1163 = vmatpush1.bf16.msra.mxu1 %v2381_v27 }
 0x15a   : > { %1121 = vmatprep.subr.bf16.mxu0 %v2280_v11  ;;  %1164 = vmatprep.subr.bf16.mxu1 %v2387_v28 }
 0x15d   : > { %1122 = vmatpush1.bf16.msra.mxu0 %v2287_v12  ;;  %1165 = vmatpush1.bf16.msra.mxu1 %v2393_v29  ;;  %v569_v12 = vunpack.c.h.bf16 %v1847_v5 }
 0x15e   : > { %1123 = vmatprep.subr.bf16.mxu0 %v2294_v13  ;;  %1166 = vmatprep.subr.bf16.mxu1 %v2399_v30 }
 0x161   : > { %1124 = vmatpush1.bf16.msra.mxu0 %v2301_v14  ;;  %1167 = vmatpush1.bf16.msra.mxu1 %v2405_v31  ;;  %v566_v14 = vunpack.c.l.bf16 %v1846_v7 }
 0x162   : > { %1125 = vmatprep.subr.bf16.mxu0 %v2308_v15  ;;  %1168 = vmatprep.subr.bf16.mxu1 %v2411_v32 }
 0x165   : > { %1126 = vmatpush1.bf16.msra.mxu0 %v2314_v16  ;;  %1169 = vmatpush1.bf16.msra.mxu1 %v2417_v33 }
 0x166   : > { %1127 = vmatprep.subr.bf16.mxu0 %v2319_v17  ;;  %1170 = vmatprep.subr.bf16.mxu1 %v2423_v34  ;;  %v1848_v17 = vld [vmem:[%s2219_s22 + $0x38] sm:$0xff] }
 0x167   : > { %v570_v45 = vunpack.c.l.bf16 %v1848_v17  ;;  %v571_v52 = vunpack.c.h.bf16 %v1848_v17 }
 0x169   : > { %1128 = vmatpush1.bf16.msra.mxu0 %v2328_v18  ;;  %1171 = vmatpush1.bf16.msra.mxu1 %v2429_v35 }
 0x16a   : > { %1502 = vmatprep.subr.bf16.mxu1 %v2333_v19 }
 0x21f   : > { %v801_v10 = vpop.f32.mrb[0].mxu0  ;;  %v844_v11 = vpop.f32.mrb[8].mxu1 }
 0x220   : > { %v853_v13 = vadd.f32 %v801_v10, %v564_v6  ;;  %v803_v15 = vpop.f32.mrb[1].mxu0  ;;  %v846_v16 = vpop.f32.mrb[9].mxu1  ;;  %v855_v47 = vadd.f32 %v844_v11, %v566_v14 }
 0x221   : > { %v854_v18 = vadd.f32 %v803_v15, %v565_v8  ;;  %v805_v39 = vpop.f32.mrb[2].mxu0  ;;  %v848_v40 = vpop.f32.mrb[10].mxu1  ;;  %v856_v53 = vadd.f32 %v846_v16, %v567_v50 }
 0x222   : > { %v861_v41 = vmul.f32 0.5, %v853_v13  ;;  %v857_v42 = vadd.f32 %v805_v39, %v568_v9  ;;  %v807_v19 = vpop.f32.mrb[3].mxu0  ;;  %v850_v43 = vpop.f32.mrb[11].mxu1  ;;  %v859_v51 = vadd.f32 %v848_v40, %v570_v45  ;;  %v1882_v45 = vld [vmem:[%s2219_s22 + $0x48] sm:$0xff] }
 0x223   : > { %v869_v44 = vmul.f32 0.5, %v854_v18  ;;  %v858_v46 = vadd.f32 %v807_v19, %v569_v12  ;;  %v860_v54 = vadd.f32 %v850_v43, %v571_v52  ;;  %v879_v60 = vmul.f32 0.5, %v856_v53  ;;  %v1881_v19 = vld [vmem:[%s2219_s22 + $0x40] sm:$0xff]  ;;  %v1883_v43 = vld [vmem:[%s2219_s22 + $0x50] sm:$0xff] }
 0x224   : > { %2112 = vtanh.f32 %v861_v41  ;;  %v862_v48 = vmul.f32 0.5, %v857_v42  ;;  %v915_v50 = vunpack.c.h.bf16 %v1883_v43  ;;  %v912_v52 = vunpack.c.l.bf16 %v1882_v45 }
 0x225   : > { %2114 = vtanh.f32 %v869_v44  ;;  %v870_v49 = vmul.f32 0.5, %v858_v46  ;;  %v880_v62 = vmul.f32 0.5, %v860_v54  ;;  %v910_v44 = vunpack.c.l.bf16 %v1881_v19 }
 0x226   : > { %2116 = vtanh.f32 %v862_v48  ;;  %v911_v46 = vunpack.c.h.bf16 %v1881_v19 }
 0x227   : > { %2118 = vtanh.f32 %v855_v47  ;;  %v914_v47 = vunpack.c.l.bf16 %v1883_v43 }
 0x228   : > { %2120 = vtanh.f32 %v870_v49 }
 0x229   : > { %2122 = vtanh.f32 %v859_v51 }
 0x22a   : > { %2124 = vtanh.f32 %v879_v60 }
 0x22b   : > { %2126 = vtanh.f32 %v880_v62 }
 0x22e   : > { %v2113_v55 = vpop.eup %2112 }
 0x22f   : > { %v2115_v56 = vpop.eup %2114  ;;  %v865_v58 = vadd.f32 1.0, %v2113_v55  ;;  %v1884_v55 = vld [vmem:[%s2219_s22 + $0x58] sm:$0xff] }
 0x230   : > { %v873_v61 = vadd.f32 1.0, %v2115_v56  ;;  %v2117_v63 = vpop.eup %2116 }
 0x231   : > { %v867_v0 = vmul.f32 0.5, %v865_v58  ;;  %v2119_v1 = vpop.eup %2118  ;;  %v866_v20 = vadd.f32 1.0, %v2117_v63 }
 0x232   : > { %v875_v2 = vmul.f32 0.5, %v873_v61  ;;  %v2121_v36 = vpop.eup %2120 }
 0x233   : > { %v889_v37 = vmul.f32 %v2119_v1, %v867_v0  ;;  %v868_v5 = vmul.f32 0.5, %v866_v20  ;;  %v874_v6 = vadd.f32 1.0, %v2121_v36  ;;  %v2123_v7 = vpop.eup %2122 }
 0x234   : > { %v887_v3 = vmul.f32 %v875_v2, %v2455_v57  ;;  %v2125_v13 = vpop.eup %2124  ;;  %v916_v2 = vunpack.c.l.bf16 %v1884_v55 }
 0x235   : > { %v876_v9 = vmul.f32 0.5, %v874_v6  ;;  %v890_v10 = vmul.f32 %v2123_v7, %v868_v5  ;;  %v2127_v14 = vpop.eup %2126  ;;  %v883_v15 = vadd.f32 1.0, %v2125_v13  ;;  %v913_v5 = vunpack.c.h.bf16 %v1882_v45 }
 0x236   : > { %v2503_v8 = vadd.f32 %v889_v37, %v887_v3  ;;  %v884_v57 = vadd.f32 1.0, %v2127_v14  ;;  %v917_v7 = vunpack.c.h.bf16 %v1884_v55 }
 0x237   : > { %v888_v11 = vmul.f32 %v876_v9, %v2458_v59  ;;  %v885_v17 = vmul.f32 0.5, %v883_v15  ;;  %v2582_v59 = vld [vmem:[%s2643_s2] sm:$0xff]  }
 0x238   : > { %2128 = vtanh.f32 %v2503_v8  ;;  %v886_v18 = vmul.f32 0.5, %v884_v57 }
 0x239   : > { %v2507_v12 = vadd.f32 %v890_v10, %v888_v11 }
 0x23b   : > { %2130 = vtanh.f32 %v2507_v12 }
 0x242   : > { %v2129_v16 = vpop.eup %2128 }
 0x243   : > { %v895_v40 = vmul.f32 %v2129_v16, %v885_v17 }
 0x245   : > { %v2131_v39 = vpop.eup %2130 }
 0x246   : > { %v896_v41 = vmul.f32 %v2131_v39, %v886_v18 }
 0x248   : > { %v2510_v42 = vpack.c.bf16 %v896_v41, %v895_v40 }
 0x24a   : > { %1146 = vmatmul.mubr.bf16.vlgmr.msra.gmra.mrb[4].mxu0 %v2510_v42  ;;  %1189 = vmatmul.mubr.bf16.vlgmr.msra.gmra.mrb[12].mxu1 %v2510_v42 }
 0x24b   : > { %1503 = vmatpush1.bf16.msra.mxu1 %v2342_v21  ;;  %1491 = vmatprep.mubr.bf16.mxu0 %v2182_v4  ;;  %v2060_v21 = vld [vmem:[%s2642_s1] ss:$16 sps:$4 sm:$0xff]  }
 0x24c   : > { %1504 = vmatprep.subr.bf16.mxu1 %v2350_v22  ;;  %1534 = vmatprep.mubr.bf16.mxu1 %v2182_v4  ;;  %v2062_v4 = vld [vmem:[%s2642_s1 + $0x4] ss:$16 sps:$4 sm:$0xff]  }
 0x24d   : > { %1459 = vmatprep.subr.bf16.mxu0 %v2062_v4  ;;  %v2065_v22 = vld [vmem:[%s2642_s1 + $0x24] ss:$16 sps:$4 sm:$0xff]  }
 0x24e   : > { %1460 = vmatpush1.bf16.msra.mxu0 %v2060_v21 }
 0x24f   : > { %1505 = vmatpush1.bf16.msra.mxu1 %v2356_v23  ;;  %v2063_v23 = vld [vmem:[%s2642_s1 + $0x20] ss:$16 sps:$4 sm:$0xff]   ;;  %1461 = vmatprep.subr.bf16.mxu0 %v2065_v22 }
 0x250   : > { %1506 = vmatprep.subr.bf16.mxu1 %v2363_v24  ;;  %v2068_v24 = vld [vmem:[%s2642_s1 + $0x44] ss:$16 sps:$4 sm:$0xff]  }
 0x252   : > { %1462 = vmatpush1.bf16.msra.mxu0 %v2063_v23 }
 0x253   : > { %1507 = vmatpush1.bf16.msra.mxu1 %v2369_v25  ;;  %v2066_v25 = vld [vmem:[%s2642_s1 + $0x40] ss:$16 sps:$4 sm:$0xff]   ;;  %1463 = vmatprep.subr.bf16.mxu0 %v2068_v24 }
 0x254   : > { %1508 = vmatprep.subr.bf16.mxu1 %v2375_v26  ;;  %v2071_v26 = vld [vmem:[%s2642_s1 + $0x64] ss:$16 sps:$4 sm:$0xff]  }
 0x256   : > { %1464 = vmatpush1.bf16.msra.mxu0 %v2066_v25 }
 0x257   : > { %1509 = vmatpush1.bf16.msra.mxu1 %v2381_v27  ;;  %v2069_v27 = vld [vmem:[%s2642_s1 + $0x60] ss:$16 sps:$4 sm:$0xff]   ;;  %1465 = vmatprep.subr.bf16.mxu0 %v2071_v26 }
 0x258   : > { %1510 = vmatprep.subr.bf16.mxu1 %v2387_v28  ;;  %v2074_v28 = vld [vmem:[%s2642_s1 + $0x84] ss:$16 sps:$4 sm:$0xff]  }
 0x25a   : > { %1466 = vmatpush1.bf16.msra.mxu0 %v2069_v27 }
 0x25b   : > { %1511 = vmatpush1.bf16.msra.mxu1 %v2393_v29  ;;  %v2072_v29 = vld [vmem:[%s2642_s1 + $0x80] ss:$16 sps:$4 sm:$0xff]   ;;  %1467 = vmatprep.subr.bf16.mxu0 %v2074_v28 }
 0x25c   : > { %1512 = vmatprep.subr.bf16.mxu1 %v2399_v30  ;;  %v2077_v30 = vld [vmem:[%s2642_s1 + $0xa4] ss:$16 sps:$4 sm:$0xff]  }
 0x25e   : > { %1468 = vmatpush1.bf16.msra.mxu0 %v2072_v29 }
 0x25f   : > { %1513 = vmatpush1.bf16.msra.mxu1 %v2405_v31  ;;  %v2075_v31 = vld [vmem:[%s2642_s1 + $0xa0] ss:$16 sps:$4 sm:$0xff]   ;;  %1469 = vmatprep.subr.bf16.mxu0 %v2077_v30 }
 0x260   : > { %1514 = vmatprep.subr.bf16.mxu1 %v2411_v32  ;;  %v2080_v32 = vld [vmem:[%s2642_s1 + $0xc4] ss:$16 sps:$4 sm:$0xff]  }
 0x262   : > { %1470 = vmatpush1.bf16.msra.mxu0 %v2075_v31 }
 0x263   : > { %1515 = vmatpush1.bf16.msra.mxu1 %v2417_v33  ;;  %v2078_v33 = vld [vmem:[%s2642_s1 + $0xc0] ss:$16 sps:$4 sm:$0xff]   ;;  %1471 = vmatprep.subr.bf16.mxu0 %v2080_v32 }
 0x264   : > { %1516 = vmatprep.subr.bf16.mxu1 %v2423_v34  ;;  %v2083_v34 = vld [vmem:[%s2642_s1 + $0xe4] ss:$16 sps:$4 sm:$0xff]  }
 0x266   : > { %1472 = vmatpush1.bf16.msra.mxu0 %v2078_v33 }
 0x267   : > { %1517 = vmatpush1.bf16.msra.mxu1 %v2429_v35  ;;  %v2081_v35 = vld [vmem:[%s2642_s1 + $0xe0] ss:$16 sps:$4 sm:$0xff]   ;;  %1473 = vmatprep.subr.bf16.mxu0 %v2083_v34 }
 0x26a   : > { %1474 = vmatpush1.bf16.msra.mxu0 %v2081_v35 }
 0x26b   : > { %1977 = vmatprep.subr.bf16.mxu0 %v2582_v59 }
 0x31d   : > { %v1147_v48 = vpop.f32.mrb[4].mxu0  ;;  %v1190_v49 = vpop.f32.mrb[12].mxu1 }
 0x31e   : > { %v1199_v51 = vadd.f32 %v1147_v48, %v910_v44  ;;  %v1149_v53 = vpop.f32.mrb[5].mxu0  ;;  %v1192_v54 = vpop.f32.mrb[13].mxu1  ;;  %v1201_v36 = vadd.f32 %v1190_v49, %v912_v52  ;;  %v2087_v48 = vld [vmem:[%s2643_s2 + $0x18] sm:$0xff]   ;;  %v2090_v49 = vld [vmem:[%s2643_s2 + $0x30] sm:$0xff]  }
 0x31f   : > { %v1200_v56 = vadd.f32 %v1149_v53, %v911_v46  ;;  %v1151_v58 = vpop.f32.mrb[6].mxu0  ;;  %v1194_v60 = vpop.f32.mrb[14].mxu1  ;;  %v1202_v9 = vadd.f32 %v1192_v54, %v913_v5  ;;  %v1919_v52 = vld [vmem:[%s2219_s22 + $0x70] sm:$0xff]  ;;  %v1918_v54 = vld [vmem:[%s2219_s22 + $0x68] sm:$0xff] }
 0x320   : > { %v1207_v61 = vmul.f32 0.5, %v1199_v51  ;;  %v1203_v62 = vadd.f32 %v1151_v58, %v914_v47  ;;  %v1153_v63 = vpop.f32.mrb[7].mxu0  ;;  %v1196_v0 = vpop.f32.mrb[15].mxu1  ;;  %v1205_v6 = vadd.f32 %v1194_v60, %v916_v2  ;;  %v2086_v47 = vld [vmem:[%s2643_s2 + $0x10] sm:$0xff]   ;;  %v1917_v51 = vld [vmem:[%s2219_s22 + $0x60] sm:$0xff]  ;;  %v1920_v2 = vld [vmem:[%s2219_s22 + $0x78] sm:$0xff] }
 0x321   : > { %v1215_v1 = vmul.f32 0.5, %v1200_v56  ;;  %v1204_v20 = vadd.f32 %v1153_v63, %v915_v50  ;;  %v1206_v10 = vadd.f32 %v1196_v0, %v917_v7  ;;  %v1225_v15 = vmul.f32 0.5, %v1202_v9  ;;  %v2091_v50 = vld [vmem:[%s2643_s2 + $0x38] sm:$0xff]  }
 0x322   : > { %2132 = vtanh.f32 %v1207_v61  ;;  %v1208_v37 = vmul.f32 0.5, %v1203_v62  ;;  %v1256_v53 = vunpack.c.l.bf16 %v1917_v51  ;;  %v1257_v55 = vunpack.c.h.bf16 %v1917_v51 }
 0x323   : > { %2134 = vtanh.f32 %v1215_v1  ;;  %v1216_v3 = vmul.f32 0.5, %v1204_v20  ;;  %v1226_v16 = vmul.f32 0.5, %v1206_v10  ;;  %v1260_v56 = vunpack.c.l.bf16 %v1919_v52 }
 0x324   : > { %2136 = vtanh.f32 %v1208_v37  ;;  %v1261_v61 = vunpack.c.h.bf16 %v1919_v52  ;;  %v1258_v63 = vunpack.c.l.bf16 %v1918_v54  ;;  %v1262_v9 = vunpack.c.l.bf16 %v1920_v2 }
 0x325   : > { %2138 = vtanh.f32 %v1201_v36 }
 0x326   : > { %2140 = vtanh.f32 %v1216_v3 }
 0x327   : > { %2142 = vtanh.f32 %v1205_v6 }
 0x328   : > { %2144 = vtanh.f32 %v1225_v15 }
 0x329   : > { %2146 = vtanh.f32 %v1226_v16 }
 0x32c   : > { %v2133_v11 = vpop.eup %2132 }
 0x32d   : > { %v2135_v13 = vpop.eup %2134  ;;  %v1211_v14 = vadd.f32 1.0, %v2133_v11 }
 0x32e   : > { %v1219_v57 = vadd.f32 1.0, %v2135_v13  ;;  %v2137_v17 = vpop.eup %2136  ;;  %v1259_v13 = vunpack.c.h.bf16 %v1918_v54 }
 0x32f   : > { %v1213_v18 = vmul.f32 0.5, %v1211_v14  ;;  %v2139_v39 = vpop.eup %2138  ;;  %v1212_v41 = vadd.f32 1.0, %v2137_v17  ;;  %v1263_v17 = vunpack.c.h.bf16 %v1920_v2 }
 0x330   : > { %v1221_v40 = vmul.f32 0.5, %v1219_v57  ;;  %v2141_v4 = vpop.eup %2140 }
 0x331   : > { %v1235_v21 = vmul.f32 %v2139_v39, %v1213_v18  ;;  %v1214_v23 = vmul.f32 0.5, %v1212_v41  ;;  %v1220_v24 = vadd.f32 1.0, %v2141_v4  ;;  %v2143_v25 = vpop.eup %2142 }
 0x332   : > { %v1233_v22 = vmul.f32 %v1221_v40, %v2503_v8  ;;  %v2145_v31 = vpop.eup %2144 }
 0x333   : > { %v1222_v27 = vmul.f32 0.5, %v1220_v24  ;;  %v1236_v28 = vmul.f32 %v2143_v25, %v1214_v23  ;;  %v2147_v32 = vpop.eup %2146  ;;  %v1229_v33 = vadd.f32 1.0, %v2145_v31 }
 0x334   : > { %v2590_v26 = vadd.f32 %v1235_v21, %v1233_v22  ;;  %v1230_v8 = vadd.f32 1.0, %v2147_v32 }
 0x335   : > { %v1234_v29 = vmul.f32 %v1222_v27, %v2507_v12  ;;  %v1231_v35 = vmul.f32 0.5, %v1229_v33  ;;  %v2085_v12 = vld [vmem:[%s2643_s2 + $0x8] sm:$0xff]  }
 0x336   : > { %2148 = vtanh.f32 %v2590_v26  ;;  %v1232_v19 = vmul.f32 0.5, %v1230_v8 }
 0x337   : > { %v2594_v30 = vadd.f32 %v1236_v28, %v1234_v29 }
 0x339   : > { %2150 = vtanh.f32 %v2594_v30 }
 0x340   : > { %v2149_v34 = vpop.eup %2148 }
 0x341   : > { %v1241_v44 = vmul.f32 %v2149_v34, %v1231_v35 }
 0x343   : > { %v2151_v43 = vpop.eup %2150 }
 0x344   : > { %v1242_v45 = vmul.f32 %v2151_v43, %v1232_v19 }
 0x346   : > { %v1243_v46 = vpack.c.bf16 %v1242_v45, %v1241_v44 }
 0x348   : > { %1492 = vmatmul.mubr.bf16.vlgmr.msra.gmra.mrb[8].mxu0 %v1243_v46  ;;  %1535 = vmatmul.mubr.bf16.vlgmr.msra.gmra.mrb[16].mxu1 %v1243_v46 }
 0x349   : > { %1978 = vmatpush3.bf16.msra.mxu0 %v2582_v59  ;;  %1993 = vmatprep.mubr.bf16.mxu0 %v2461_v38  ;;  %v2088_v59 = vld [vmem:[%s2643_s2 + $0x20] sm:$0xff]   ;;  %v2089_v38 = vld [vmem:[%s2643_s2 + $0x28] sm:$0xff]  }
 0x34a   : > { %1979 = vmatprep.subr.bf16.mxu0 %v2085_v12 }
 0x34d   : > { %1980 = vmatpush3.bf16.msra.mxu0 %v2085_v12 }
 0x34e   : > { %1981 = vmatprep.subr.bf16.mxu0 %v2086_v47 }
 0x351   : > { %1982 = vmatpush3.bf16.msra.mxu0 %v2086_v47 }
 0x352   : > { %1983 = vmatprep.subr.bf16.mxu0 %v2087_v48 }
 0x355   : > { %1984 = vmatpush3.bf16.msra.mxu0 %v2087_v48 }
 0x356   : > { %1985 = vmatprep.subr.bf16.mxu0 %v2088_v59 }
 0x359   : > { %1986 = vmatpush3.bf16.msra.mxu0 %v2088_v59 }
 0x35a   : > { %1987 = vmatprep.subr.bf16.mxu0 %v2089_v38 }
 0x35d   : > { %1988 = vmatpush3.bf16.msra.mxu0 %v2089_v38 }
 0x35e   : > { %1989 = vmatprep.subr.bf16.mxu0 %v2090_v49 }
 0x361   : > { %1990 = vmatpush3.bf16.msra.mxu0 %v2090_v49 }
 0x362   : > { %1991 = vmatprep.subr.bf16.mxu0 %v2091_v50 }
 0x365   : > { %1992 = vmatpush3.bf16.msra.mxu0 %v2091_v50 }
 0x368   : > { %1994 = vmatmul.mubr.bf16.vlgmr.msra.gmra.mrb[12].mxu0 %v2510_v42 }
 0x369   : > { %1997 = vmatprep.mubr.bf16.mxu0 %v1243_v46 }
 0x41b   : > { %v1493_v58 = vpop.f32.mrb[8].mxu0  ;;  %v1536_v60 = vpop.f32.mrb[16].mxu1 }
 0x41c   : > { %v1545_v62 = vadd.f32 %v1493_v58, %v1256_v53  ;;  %v1495_v0 = vpop.f32.mrb[9].mxu0  ;;  %v1538_v1 = vpop.f32.mrb[17].mxu1  ;;  %v1547_v11 = vadd.f32 %v1536_v60, %v1258_v63 }
 0x41d   : > { %v1546_v20 = vadd.f32 %v1495_v0, %v1257_v55  ;;  %v1497_v36 = vpop.f32.mrb[10].mxu0  ;;  %v1540_v37 = vpop.f32.mrb[18].mxu1  ;;  %v1548_v16 = vadd.f32 %v1538_v1, %v1259_v13 }
 0x41e   : > { %v1553_v3 = vmul.f32 0.5, %v1545_v62  ;;  %v1549_v42 = vadd.f32 %v1497_v36, %v1260_v56  ;;  %v1499_v5 = vpop.f32.mrb[11].mxu0  ;;  %v1542_v6 = vpop.f32.mrb[19].mxu1  ;;  %v1551_v57 = vadd.f32 %v1540_v37, %v1262_v9 }
 0x41f   : > { %v1561_v7 = vmul.f32 0.5, %v1546_v20  ;;  %v1550_v10 = vadd.f32 %v1499_v5, %v1261_v61  ;;  %v1571_v18 = vmul.f32 0.5, %v1548_v16  ;;  %v1552_v39 = vadd.f32 %v1542_v6, %v1263_v17 }
 0x420   : > { %2152 = vtanh.f32 %v1553_v3  ;;  %v1554_v14 = vmul.f32 0.5, %v1549_v42 }
 0x421   : > { %2154 = vtanh.f32 %v1561_v7  ;;  %v1562_v15 = vmul.f32 0.5, %v1550_v10  ;;  %v1572_v22 = vmul.f32 0.5, %v1552_v39 }
 0x422   : > { %2156 = vtanh.f32 %v1554_v14 }
 0x423   : > { %2158 = vtanh.f32 %v1547_v11 }
 0x424   : > { %2160 = vtanh.f32 %v1562_v15 }
 0x425   : > { %2162 = vtanh.f32 %v1551_v57 }
 0x426   : > { %2164 = vtanh.f32 %v1571_v18 }
 0x427   : > { %2166 = vtanh.f32 %v1572_v22 }
 0x42a   : > { %v2153_v40 = vpop.eup %2152 }
 0x42b   : > { %v2155_v41 = vpop.eup %2154  ;;  %v1557_v4 = vadd.f32 1.0, %v2153_v40 }
 0x42c   : > { %v1565_v21 = vadd.f32 1.0, %v2155_v41  ;;  %v2157_v23 = vpop.eup %2156 }
 0x42d   : > { %v1559_v24 = vmul.f32 0.5, %v1557_v4  ;;  %v2159_v25 = vpop.eup %2158  ;;  %v1558_v28 = vadd.f32 1.0, %v2157_v23 }
 0x42e   : > { %v1567_v27 = vmul.f32 0.5, %v1565_v21  ;;  %v2161_v29 = vpop.eup %2160 }
 0x42f   : > { %v1581_v31 = vmul.f32 %v2159_v25, %v1559_v24  ;;  %v1560_v33 = vmul.f32 0.5, %v1558_v28  ;;  %v1566_v8 = vadd.f32 1.0, %v2161_v29  ;;  %v2163_v34 = vpop.eup %2162 }
 0x430   : > { %v1579_v32 = vmul.f32 %v1567_v27, %v2590_v26  ;;  %v2165_v45 = vpop.eup %2164  ;;  %v1953_v26 = vld [vmem:[%s2644_s3] ss:$0 sm:$0xff] }
 0x431   : > { %v1568_v19 = vmul.f32 0.5, %v1566_v8  ;;  %v1582_v43 = vmul.f32 %v2163_v34, %v1560_v33  ;;  %v1575_v12 = vadd.f32 1.0, %v2165_v45  ;;  %v2167_v47 = vpop.eup %2166 }
 0x432   : > { %v1583_v35 = vadd.f32 %v1581_v31, %v1579_v32  ;;  %v1576_v50 = vadd.f32 1.0, %v2167_v47 }
 0x433   : > { %v1580_v44 = vmul.f32 %v1568_v19, %v2594_v30  ;;  %v1577_v49 = vmul.f32 0.5, %v1575_v12 }
 0x434   : > { %2168 = vtanh.f32 %v1583_v35  ;;  %1591 = vst [vmem:[#allocation3] sm:$0xff] %v1583_v35  ;;  %v1578_v58 = vmul.f32 0.5, %v1576_v50 }
 0x435   : > { %v1584_v46 = vadd.f32 %v1582_v43, %v1580_v44 }
 0x437   : > { %2170 = vtanh.f32 %v1584_v46  ;;  %1592 = vst [vmem:[#allocation3 + $0x8] sm:$0xff] %v1584_v46 }
 0x43b   : > { %v1995_v48 = vpop.f32.mrb[12].mxu0 }
 0x43c   : > { %v1713_v59 = vadd.f32 %v1995_v48, %v1953_v26  ;;  %v1704_v38 = vpop.f32.mrb[13].mxu0 }
 0x43d   : > { %v1705_v30 = vadd.f32 %v1953_v26, %v1704_v38  ;;  %v1996_v51 = vpop.f32.mrb[14].mxu0 }
 0x43e   : > { %v2169_v52 = vpop.eup %2168  ;;  %1737 = vst [vmem:[%s2224_s25 + $0x10] sm:$0xff] %v1713_v59  ;;  %v1716_v53 = vadd.f32 %v1996_v51, %v1953_v26  ;;  %v1707_v54 = vpop.f32.mrb[15].mxu0 }
 0x43f   : > { %1735 = vst [vmem:[%s2224_s25] sm:$0xff] %v1705_v30  ;;  %v1708_v55 = vadd.f32 %v1953_v26, %v1707_v54  ;;  %v1587_v56 = vmul.f32 %v2169_v52, %v1577_v49 }
 0x440   : > { %1738 = vst [vmem:[%s2224_s25 + $0x18] sm:$0xff] %v1716_v53 }
 0x441   : > { %1736 = vst [vmem:[%s2224_s25 + $0x8] sm:$0xff] %v1708_v55  ;;  %v2171_v60 = vpop.eup %2170 }
 0x442   : > { %v1588_v61 = vmul.f32 %v2171_v60, %v1578_v58 }
 0x444   : > { %v1589_v62 = vpack.c.bf16 %v1588_v61, %v1587_v56 }
 0x446   : > { %1590 = vst [vmem:[#allocation2] sm:$0xff] %v1589_v62  ;;  %1998 = vmatmul.mubr.bf16.gmra.mrb[16].mxu0 %v1589_v62 }
 0x519   : > { %v1999_v63 = vpop.f32.mrb[16].mxu0 }
 0x51a   : > { %v1729_v0 = vadd.f32 %v1999_v63, %v1953_v26  ;;  %v1720_v1 = vpop.f32.mrb[17].mxu0 }
 0x51b   : > { %v1721_v2 = vadd.f32 %v1953_v26, %v1720_v1  ;;  %v2000_v20 = vpop.f32.mrb[18].mxu0 }
 0x51c   : > { %1741 = vst [vmem:[%s2224_s25 + $0x30] sm:$0xff] %v1729_v0  ;;  %v1732_v36 = vadd.f32 %v2000_v20, %v1953_v26  ;;  %v1723_v37 = vpop.f32.mrb[19].mxu0 }
 0x51d   : > { %1739 = vst [vmem:[%s2224_s25 + $0x20] sm:$0xff] %v1721_v2  ;;  %v1724_v3 = vadd.f32 %v1953_v26, %v1723_v37 }
 0x51e   : > { %1742 = vst [vmem:[%s2224_s25 + $0x38] sm:$0xff] %v1732_v36 }
 0x51f   : > { %1740 = vst [vmem:[%s2224_s25 + $0x28] sm:$0xff] %v1724_v3 }
 0x520 PF: > { %s14_s15 = sadd.s32 1, %s2178_s15  }
 0x521   : > { %p11_p5 = scmp.ge.s32.totalorder %s14_s15, 4  }
 0x523   :  { %13 = sbr.rel (!%p11_p5) target bundleno = 1 (0x1), region = 77 }

</bundles_post_ra>
